<compile_context>
chip_gen: v5e
topology: v5e:2x2
jax: 0.10.0
libtpu: 0.0.40
codegen_flags: <defaults>
</compile_context>

<pallas_src>
import functools

import jax
import jax.numpy as jnp
from jax import lax
from jax.experimental import pallas as pl
from jax.experimental.pallas import tpu as pltpu

n_classes = 2
n_time = 24


def _sigmoid(z):
    # sigmoid(z) = 0.5 * (1 + tanh(z / 2)) -- single EUP op, no VPU divide.
    return 0.5 * (jnp.tanh(0.5 * z) + 1.0)


def _ann_kernel(x_ref, w1_ref, b1_ref, w2_ref, b2_ref, w3_ref, b3_ref, oT_ref):
    """One batch tile of the 3-layer MLP.

    x_ref  : (TB, n_time)    natural (batch, feature) layout straight from HBM
    w*_ref : (out, in)       PyTorch-layout weights (VMEM-resident across tiles)
    b*_ref : (out, 1)        biases, broadcast over the lane (batch) dim
    oT_ref : (n_classes, TB) lane-dense output tile
    """
    # Layer 1: w1 @ x.T done by contracting x's last (feature) axis directly;
    # Mosaic handles the transposed operand (same pattern as q @ k.T).
    h1 = _sigmoid(
        lax.dot_general(
            w1_ref[...],
            x_ref[...],
            dimension_numbers=(((1,), (1,)), ((), ())),
            preferred_element_type=jnp.float32,
        )
        + b1_ref[...]
    )
    h2 = _sigmoid(
        jnp.dot(w2_ref[...], h1, preferred_element_type=jnp.float32) + b2_ref[...]
    )
    y = _sigmoid(
        jnp.dot(w3_ref[...], h2, preferred_element_type=jnp.float32) + b3_ref[...]
    )
    oT_ref[...] = y.astype(oT_ref.dtype)


def _round_up(n, m):
    return ((n + m - 1) // m) * m


@functools.partial(jax.jit, static_argnames=("tile_batch",))
def ann_forward(x, w1, b1, w2, b2, w3, b3, *, tile_batch=4096):
    """Equivalent of ANN.forward.

    Weights/biases are in PyTorch layout: w is (out_features, in_features),
    b is (out_features,).  Returns (batch, n_classes).
    """
    x2d = x.reshape(-1, n_time).astype(jnp.float32)
    batch = x2d.shape[0]
    dim_hidden = w1.shape[0]

    # Large tiles amortize the ~0.35 us fixed per-step overhead; clamp so that
    # (when the batch allows) there are at least 2 tiles for v7x's two
    # TensorCores.  Always a multiple of 128 (lane-aligned), min 128.
    tb = max(128, min(tile_batch, _round_up(max((batch + 1) // 2, 1), 128)))
    num_tiles = pl.cdiv(batch, tb)

    w1 = w1.astype(jnp.float32)
    w2 = w2.astype(jnp.float32)
    w3 = w3.astype(jnp.float32)
    b1c = b1.reshape(dim_hidden, 1).astype(jnp.float32)
    b2c = b2.reshape(dim_hidden, 1).astype(jnp.float32)
    b3c = b3.reshape(n_classes, 1).astype(jnp.float32)

    # Weights/biases: constant index_map -> stay resident in VMEM across tiles.
    resident = lambda shape: pl.BlockSpec(shape, lambda i: (0, 0))

    outT = pl.pallas_call(
        _ann_kernel,
        out_shape=jax.ShapeDtypeStruct((n_classes, batch), jnp.float32),
        grid=(num_tiles,),
        in_specs=[
            pl.BlockSpec((tb, n_time), lambda i: (i, 0)),   # x: natural layout
            resident(w1.shape),
            resident((dim_hidden, 1)),
            resident(w2.shape),
            resident((dim_hidden, 1)),
            resident(w3.shape),
            resident((n_classes, 1)),
        ],
        out_specs=pl.BlockSpec((n_classes, tb), lambda i: (0, i)),
        compiler_params=pltpu.CompilerParams(
            dimension_semantics=("parallel",),
        ),
    )(x2d, w1, b1c, w2, b2c, w3, b3c)

    # Tiny (n_classes, batch) -> (batch, n_classes) transpose to match the
    # PyTorch module's output layout.
    return outT.T


def init_linear_params(key, fan_in, fan_out):
    """Deterministic init mimicking torch.nn.Linear (uniform +/- 1/sqrt(fan_in)).

    Weight is in PyTorch layout (fan_out, fan_in); bias is (fan_out,).
    """
    kw, kb = jax.random.split(key)
    bound = 1.0 / jnp.sqrt(jnp.float32(fan_in))
    w = jax.random.uniform(kw, (fan_out, fan_in), jnp.float32, -bound, bound)
    b = jax.random.uniform(kb, (fan_out,), jnp.float32, -bound, bound)
    return w, b


if __name__ == "__main__":
    dim_hidden = 32
    n_timeseries = 100  # matches the module's n_timeseries; also exercises a ragged tile

    key = jax.random.PRNGKey(0)
    k_x, k1, k2, k3 = jax.random.split(key, 4)

    # Example input consistent with the module: (n_timeseries, n_time).
    x = jax.random.normal(k_x, (n_timeseries, n_time), jnp.float32)

    w1, b1 = init_linear_params(k1, n_time, dim_hidden)
    w2, b2 = init_linear_params(k2, dim_hidden, dim_hidden)
    w3, b3 = init_linear_params(k3, dim_hidden, n_classes)

    out = ann_forward(x, w1, b1, w2, b2, w3, b3)
    out = jax.block_until_ready(out)

    # Pure-JAX reference check (same math as the PyTorch module).
    def ref(x):
        h = x.reshape(-1, n_time)
        h = jax.nn.sigmoid(h @ w1.T + b1)
        h = jax.nn.sigmoid(h @ w2.T + b2)
        return jax.nn.sigmoid(h @ w3.T + b3)

    expected = ref(x)
    assert out.shape == (n_timeseries, n_classes)
    assert jnp.allclose(out, expected, atol=1e-5, rtol=1e-5)

    print("KERNEL_OK")
</pallas_src>

<mosaic_0001>
module attributes {stable_mosaic.version = 11 : i64} {
  func.func @_ann_kernel(%arg0: i32, %arg1: memref<128x24xf32, #tpu.memory_space<vmem>>, %arg2: memref<32x24xf32, #tpu.memory_space<vmem>>, %arg3: memref<32x1xf32, #tpu.memory_space<vmem>>, %arg4: memref<32x32xf32, #tpu.memory_space<vmem>>, %arg5: memref<32x1xf32, #tpu.memory_space<vmem>>, %arg6: memref<2x32xf32, #tpu.memory_space<vmem>>, %arg7: memref<2x1xf32, #tpu.memory_space<vmem>>, %arg8: memref<2x128xf32, #tpu.memory_space<vmem>>) attributes {dimension_semantics = [#tpu.dimension_semantics<parallel>], iteration_bounds = array<i64: 1>, scalar_prefetch = 0 : i64, scratch_operands = 0 : i64, tpu.core_type = #tpu.core_type<tc>, window_params = [{transform_indices = @transform_0, window_bounds = array<i64: 128, 24>}, {pipeline_mode = #tpu.pipeline_mode<synchronous>, transform_indices = @transform_1, window_bounds = array<i64: 32, 24>}, {pipeline_mode = #tpu.pipeline_mode<synchronous>, transform_indices = @transform_2, window_bounds = array<i64: 32, 1>}, {pipeline_mode = #tpu.pipeline_mode<synchronous>, transform_indices = @transform_3, window_bounds = array<i64: 32, 32>}, {pipeline_mode = #tpu.pipeline_mode<synchronous>, transform_indices = @transform_4, window_bounds = array<i64: 32, 1>}, {pipeline_mode = #tpu.pipeline_mode<synchronous>, transform_indices = @transform_5, window_bounds = array<i64: 2, 32>}, {pipeline_mode = #tpu.pipeline_mode<synchronous>, transform_indices = @transform_6, window_bounds = array<i64: 2, 1>}, {transform_indices = @transform_7, window_bounds = array<i64: 2, 128>}]} {
    %c0 = arith.constant 0 : index
    %c0_0 = arith.constant 0 : index
    %0 = vector.load %arg2[%c0, %c0_0] : memref<32x24xf32, #tpu.memory_space<vmem>>, vector<32x24xf32>
    %c0_1 = arith.constant 0 : index
    %c0_2 = arith.constant 0 : index
    %1 = vector.load %arg1[%c0_1, %c0_2] : memref<128x24xf32, #tpu.memory_space<vmem>>, vector<128x24xf32>
    %cst = arith.constant dense<0.000000e+00> : vector<32x128xf32>
    %2 = tpu.matmul %0, %1, %cst {dimension_numbers = #tpu.dot_dimension_numbers<[1], [1], [0], [0], [0, 0, 1, 0], [], []>} : vector<32x24xf32>, vector<128x24xf32>, vector<32x128xf32> -> vector<32x128xf32>
    %c0_3 = arith.constant 0 : index
    %c0_4 = arith.constant 0 : index
    %3 = vector.load %arg3[%c0_3, %c0_4] : memref<32x1xf32, #tpu.memory_space<vmem>>, vector<32x1xf32>
    %4 = vector.broadcast %3 : vector<32x1xf32> to vector<32x128xf32>
    %5 = arith.addf %2, %4 : vector<32x128xf32>
    %cst_5 = arith.constant 5.000000e-01 : f32
    %6 = vector.broadcast %cst_5 : f32 to vector<32x128xf32>
    %7 = arith.mulf %6, %5 : vector<32x128xf32>
    %8 = math.tanh %7 : vector<32x128xf32>
    %cst_6 = arith.constant 1.000000e+00 : f32
    %9 = vector.broadcast %cst_6 : f32 to vector<32x128xf32>
    %10 = arith.addf %8, %9 : vector<32x128xf32>
    %cst_7 = arith.constant 5.000000e-01 : f32
    %11 = vector.broadcast %cst_7 : f32 to vector<32x128xf32>
    %12 = arith.mulf %11, %10 : vector<32x128xf32>
    %c0_8 = arith.constant 0 : index
    %c0_9 = arith.constant 0 : index
    %13 = vector.load %arg4[%c0_8, %c0_9] : memref<32x32xf32, #tpu.memory_space<vmem>>, vector<32x32xf32>
    %cst_10 = arith.constant dense<0.000000e+00> : vector<32x128xf32>
    %14 = tpu.matmul %13, %12, %cst_10 {dimension_numbers = #tpu.dot_dimension_numbers<[1], [0], [0], [1], [0, 0, 1, 1], [], []>} : vector<32x32xf32>, vector<32x128xf32>, vector<32x128xf32> -> vector<32x128xf32>
    %c0_11 = arith.constant 0 : index
    %c0_12 = arith.constant 0 : index
    %15 = vector.load %arg5[%c0_11, %c0_12] : memref<32x1xf32, #tpu.memory_space<vmem>>, vector<32x1xf32>
    %16 = vector.broadcast %15 : vector<32x1xf32> to vector<32x128xf32>
    %17 = arith.addf %14, %16 : vector<32x128xf32>
    %cst_13 = arith.constant 5.000000e-01 : f32
    %18 = vector.broadcast %cst_13 : f32 to vector<32x128xf32>
    %19 = arith.mulf %18, %17 : vector<32x128xf32>
    %20 = math.tanh %19 : vector<32x128xf32>
    %cst_14 = arith.constant 1.000000e+00 : f32
    %21 = vector.broadcast %cst_14 : f32 to vector<32x128xf32>
    %22 = arith.addf %20, %21 : vector<32x128xf32>
    %cst_15 = arith.constant 5.000000e-01 : f32
    %23 = vector.broadcast %cst_15 : f32 to vector<32x128xf32>
    %24 = arith.mulf %23, %22 : vector<32x128xf32>
    %c0_16 = arith.constant 0 : index
    %c0_17 = arith.constant 0 : index
    %25 = vector.load %arg6[%c0_16, %c0_17] : memref<2x32xf32, #tpu.memory_space<vmem>>, vector<2x32xf32>
    %cst_18 = arith.constant dense<0.000000e+00> : vector<2x128xf32>
    %26 = tpu.matmul %25, %24, %cst_18 {dimension_numbers = #tpu.dot_dimension_numbers<[1], [0], [0], [1], [0, 0, 1, 1], [], []>} : vector<2x32xf32>, vector<32x128xf32>, vector<2x128xf32> -> vector<2x128xf32>
    %c0_19 = arith.constant 0 : index
    %c0_20 = arith.constant 0 : index
    %27 = vector.load %arg7[%c0_19, %c0_20] : memref<2x1xf32, #tpu.memory_space<vmem>>, vector<2x1xf32>
    %28 = vector.broadcast %27 : vector<2x1xf32> to vector<2x128xf32>
    %29 = arith.addf %26, %28 : vector<2x128xf32>
    %cst_21 = arith.constant 5.000000e-01 : f32
    %30 = vector.broadcast %cst_21 : f32 to vector<2x128xf32>
    %31 = arith.mulf %30, %29 : vector<2x128xf32>
    %32 = math.tanh %31 : vector<2x128xf32>
    %cst_22 = arith.constant 1.000000e+00 : f32
    %33 = vector.broadcast %cst_22 : f32 to vector<2x128xf32>
    %34 = arith.addf %32, %33 : vector<2x128xf32>
    %cst_23 = arith.constant 5.000000e-01 : f32
    %35 = vector.broadcast %cst_23 : f32 to vector<2x128xf32>
    %36 = arith.mulf %35, %34 : vector<2x128xf32>
    %c0_24 = arith.constant 0 : index
    %c0_25 = arith.constant 0 : index
    %37 = vector.load %arg8[%c0_24, %c0_25] : memref<2x128xf32, #tpu.memory_space<vmem>>, vector<2x128xf32>
    tpu.vector_store %arg8[%c0_24, %c0_25], %36 {strides = array<i32>} : memref<2x128xf32, #tpu.memory_space<vmem>>, vector<2x128xf32>,
    return
  }
  func.func @transform_0(%arg0: i32) -> (i32, i32) {
    %c0_i32 = arith.constant 0 : i32
    %c0_i32_0 = arith.constant 0 : i32
    return %arg0, %c0_i32 : i32, i32
  }
  func.func @transform_1(%arg0: i32) -> (i32, i32) {
    %c0_i32 = arith.constant 0 : i32
    %c0_i32_0 = arith.constant 0 : i32
    %c0_i32_1 = arith.constant 0 : i32
    return %c0_i32, %c0_i32_0 : i32, i32
  }
  func.func @transform_2(%arg0: i32) -> (i32, i32) {
    %c0_i32 = arith.constant 0 : i32
    %c0_i32_0 = arith.constant 0 : i32
    %c0_i32_1 = arith.constant 0 : i32
    return %c0_i32, %c0_i32_0 : i32, i32
  }
  func.func @transform_3(%arg0: i32) -> (i32, i32) {
    %c0_i32 = arith.constant 0 : i32
    %c0_i32_0 = arith.constant 0 : i32
    %c0_i32_1 = arith.constant 0 : i32
    return %c0_i32, %c0_i32_0 : i32, i32
  }
  func.func @transform_4(%arg0: i32) -> (i32, i32) {
    %c0_i32 = arith.constant 0 : i32
    %c0_i32_0 = arith.constant 0 : i32
    %c0_i32_1 = arith.constant 0 : i32
    return %c0_i32, %c0_i32_0 : i32, i32
  }
  func.func @transform_5(%arg0: i32) -> (i32, i32) {
    %c0_i32 = arith.constant 0 : i32
    %c0_i32_0 = arith.constant 0 : i32
    %c0_i32_1 = arith.constant 0 : i32
    return %c0_i32, %c0_i32_0 : i32, i32
  }
  func.func @transform_6(%arg0: i32) -> (i32, i32) {
    %c0_i32 = arith.constant 0 : i32
    %c0_i32_0 = arith.constant 0 : i32
    %c0_i32_1 = arith.constant 0 : i32
    return %c0_i32, %c0_i32_0 : i32, i32
  }
  func.func @transform_7(%arg0: i32) -> (i32, i32) {
    %c0_i32 = arith.constant 0 : i32
    %c0_i32_0 = arith.constant 0 : i32
    return %c0_i32, %arg0 : i32, i32
  }
}

</mosaic_0001>

<bundles_post_ra>
// kernel: ann_forward.1
= control target key start
LH: loop header
LB: loop body
LE: loop exit
PB: predicated region body
PF: predicated region fallthrough
CT: control target
= control target key end

     0   :  { %vm71_vm0 = vcmask 195584   ;;  %s592_s0 = inlined_call_operand.vmem [shape: f32[100,24], index: 0, kind: input, shape index: {}]   ;;  %s593_s1 = inlined_call_operand.vmem [shape: f32[32,24], index: 1, kind: input, shape index: {}]   ;;  %s594_s2 = inlined_call_operand.vmem [shape: f32[32,1], index: 2, kind: input, shape index: {}]   ;;  %s595_s3 = inlined_call_operand.vmem [shape: f32[32,32], index: 3, kind: input, shape index: {}]   ;;  %s596_s4 = inlined_call_operand.vmem [shape: f32[32,1], index: 4, kind: input, shape index: {}]   ;;  %s597_s5 = inlined_call_operand.vmem [shape: f32[2,32], index: 5, kind: input, shape index: {}]   ;;  %s598_s6 = inlined_call_operand.vmem [shape: f32[2,1], index: 6, kind: input, shape index: {}]   ;;  %s599_s7 = inlined_call_operand.hbm [shape: f32[2,100], index: 7, kind: output, shape index: {}]  }
   0x1   :  { %v46_v0 = vld [vmem:[%s592_s0 + $0x78] sm:$0xff]  ;;  %v45_v1 = vld [vmem:[%s592_s0 + $0x70] sm:$0xff] }
   0x2   :  { %339 = vmatpush.xpose.msk.msra.mxu3 %vm71_vm0, %v46_v0  ;;  %314 = vmatpush.xpose.msk.msra.mxu0 %vm71_vm0, %v46_v0 }
   0x3   :  { %12 = vsyncpa [#allocation3], 0  ;;  %v44_v2 = vld [vmem:[%s592_s0 + $0x68] sm:$0xff]  ;;  %v43_v3 = vld [vmem:[%s592_s0 + $0x60] sm:$0xff]  ;;  %v404_v14 = vmov 0   ;;  %vm205_vm1 = vcmask 261120  }
   0x4   :  { %v42_v4 = vld [vmem:[%s592_s0 + $0x58] sm:$0xff]  ;;  %v41_v5 = vld [vmem:[%s592_s0 + $0x50] sm:$0xff]  ;;  %v40_v6 = vld [vmem:[%s592_s0 + $0x48] sm:$0xff]  ;;  %357 = vset.pattern.permute.xlu0 %v404_v14  ;;  %358 = vset.pattern.permute.xlu1 %v404_v14  ;;  %s305_s20 = sshll.u32 %s599_s7, 4  ;;  %s306_s20 = int_to_ptr.hbm [resolvable:$true] %s305_s20 }
   0x5   :  { %v39_v7 = vld [vmem:[%s592_s0 + $0x40] sm:$0xff]  ;;  %v38_v8 = vld [vmem:[%s592_s0 + $0x38] sm:$0xff]  ;;  %v37_v9 = vld [vmem:[%s592_s0 + $0x30] sm:$0xff]  ;;  %359 = vset.pattern.permute.xlu2 %v404_v14 }
   0x6   :  { %340 = vmatpush.xpose.msk.msra.mxu3 %vm71_vm0, %v45_v1  ;;  %315 = vmatpush.xpose.msk.msra.mxu0 %vm71_vm0, %v45_v1  ;;  %v36_v10 = vld [vmem:[%s592_s0 + $0x28] sm:$0xff]  ;;  %v50_v11 = vld [vmem:[%s594_s2 + $0x18] sm:$0xff]  ;;  %v35_v13 = vld [vmem:[%s592_s0 + $0x20] sm:$0xff] }
   0x7   :  { %v48_v12 = vld [vmem:[%s594_s2 + $0x8] sm:$0xff]  ;;  %68 = vperm.xlu0 %357, %v50_v11   ;;  %v34_v15 = vld [vmem:[%s592_s0 + $0x18] sm:$0xff]  ;;  %v49_v16 = vld [vmem:[%s594_s2 + $0x10] sm:$0xff] }
   0x8   :  { %58 = vperm.xlu1 %358, %v48_v12   ;;  %v47_v17 = vld [vmem:[%s594_s2] sm:$0xff]  ;;  %v33_v18 = vld [vmem:[%s592_s0 + $0x10] sm:$0xff]  ;;  %v32_v19 = vld [vmem:[%s592_s0 + $0x8] sm:$0xff]  ;;  %s405_s2 = smov [#allocation2]  }
   0x9   :  { %v182_v20 = vld [vmem:[%s596_s4 + $0x8] sm:$0xff]  ;;  %v181_v21 = vld [vmem:[%s596_s4] sm:$0xff]  ;;  %v29_v25 = vld [vmem:[%s593_s1 + $0x10] sm:$0xff]  ;;  %s303_s17 = sshll.u32 %s405_s2, 4  ;;  %s304_s17 = int_to_ptr.vmem [resolvable:$true] %s303_s17 }
   0xa   :  { %341 = vmatpush.xpose.msk.msra.mxu3 %vm71_vm0, %v44_v2  ;;  %316 = vmatpush.xpose.msk.msra.mxu0 %vm71_vm0, %v44_v2  ;;  %v31_v22 = vld [vmem:[%s592_s0] sm:$0xff]  ;;  %v28_v23 = vld [vmem:[%s593_s1 + $0x8] sm:$0xff]  ;;  %v30_v26 = vld [vmem:[%s593_s1 + $0x18] sm:$0xff] }
   0xb   :  { %v27_v24 = vld [vmem:[%s593_s1] sm:$0xff]  ;;  %v184_v51 = vld [vmem:[%s596_s4 + $0x18] sm:$0xff]  ;;  %v183_v57 = vld [vmem:[%s596_s4 + $0x10] sm:$0xff] }
   0xc   :  { %202 = vperm.xlu2 %359, %v184_v51   ;;  %v177_v56 = vld [vmem:[%s595_s3] sm:$0xff]  ;;  %v178_v58 = vld [vmem:[%s595_s3 + $0x8] sm:$0xff]  ;;  %v179_v60 = vld [vmem:[%s595_s3 + $0x10] sm:$0xff] }
   0xd   :  { %v264_v59 = vld [vmem:[%s598_s6] sm:$0x3]  ;;  %v180_v61 = vld [vmem:[%s595_s3 + $0x18] sm:$0xff] }
   0xe   :  { %342 = vmatpush.xpose.msk.msra.mxu3 %vm71_vm0, %v43_v3  ;;  %317 = vmatpush.xpose.msk.msra.mxu0 %vm71_vm0, %v43_v3 }
   0xf   :  { %63 = vperm.xlu0 %357, %v49_v16  }
  0x10   :  { %53 = vperm.xlu1 %358, %v47_v17  }
  0x12   :  { %343 = vmatpush.xpose.msk.msra.mxu3 %vm71_vm0, %v42_v4  ;;  %318 = vmatpush.xpose.msk.msra.mxu0 %vm71_vm0, %v42_v4 }
  0x14   :  { %197 = vperm.xlu2 %359, %v183_v57  }
  0x16   :  { %344 = vmatpush.xpose.msk.msra.mxu3 %vm71_vm0, %v41_v5  ;;  %319 = vmatpush.xpose.msk.msra.mxu0 %vm71_vm0, %v41_v5 }
  0x17   :  { %192 = vperm.xlu0 %357, %v182_v20  }
  0x18   :  { %187 = vperm.xlu1 %358, %v181_v21  }
  0x1a   :  { %345 = vmatpush.xpose.msk.msra.mxu3 %vm71_vm0, %v40_v6  ;;  %320 = vmatpush.xpose.msk.msra.mxu0 %vm71_vm0, %v40_v6 }
  0x1c   :  { %267 = vperm.xlu2 %359, %v264_v59  }
  0x1e   :  { %346 = vmatpush.xpose.msk.msra.mxu3 %vm71_vm0, %v39_v7  ;;  %321 = vmatpush.xpose.msk.msra.mxu0 %vm71_vm0, %v39_v7 }
  0x22   :  { %347 = vmatpush.xpose.msk.msra.mxu3 %vm71_vm0, %v38_v8  ;;  %322 = vmatpush.xpose.msk.msra.mxu0 %vm71_vm0, %v38_v8 }
  0x26   :  { %348 = vmatpush.xpose.msk.msra.mxu3 %vm71_vm0, %v37_v9  ;;  %323 = vmatpush.xpose.msk.msra.mxu0 %vm71_vm0, %v37_v9 }
  0x2a   :  { %349 = vmatpush.xpose.msk.msra.mxu3 %vm71_vm0, %v36_v10  ;;  %324 = vmatpush.xpose.msk.msra.mxu0 %vm71_vm0, %v36_v10 }
  0x2e   :  { %350 = vmatpush.xpose.msk.msra.mxu3 %vm71_vm0, %v35_v13  ;;  %325 = vmatpush.xpose.msk.msra.mxu0 %vm71_vm0, %v35_v13 }
  0x32   :  { %351 = vmatpush.xpose.msk.msra.mxu3 %vm71_vm0, %v34_v15  ;;  %326 = vmatpush.xpose.msk.msra.mxu0 %vm71_vm0, %v34_v15 }
  0x36   :  { %352 = vmatpush.xpose.msk.msra.mxu3 %vm71_vm0, %v33_v18  ;;  %327 = vmatpush.xpose.msk.msra.mxu0 %vm71_vm0, %v33_v18 }
  0x3a   :  { %353 = vmatpush.xpose.msk.msra.mxu3 %vm71_vm0, %v32_v19  ;;  %328 = vmatpush.xpose.msk.msra.mxu0 %vm71_vm0, %v32_v19 }
  0x3e   :  { %354 = vmatpush.xpose.msk.msra.mxu3 %vm71_vm0, %v31_v22  ;;  %329 = vmatpush.xpose.msk.msra.mxu0 %vm71_vm0, %v31_v22 }
  0x41   :  { %331 = vmatmul.msk.f32.vlgmr.msra.gmra.mxu3 %vm71_vm0, %v28_v23  ;;  %330 = vmatmul.msk.f32.vlgmr.msra.gmra.mxu0 %vm71_vm0, %v27_v24 }
  0x49   :  { %332 = vmatmul.msk.f32.gmra.mxu3 %vm71_vm0, %v29_v25 }
  0x51   :  { %333 = vmatmul.msk.f32.gmra.mxu3 %vm71_vm0, %v30_v26  ;;  %v263_v26 = vld [vmem:[%s597_s5] sm:$0x3] }
  0x66   :  { %v203_v63 = vpop.permute.xlu2 %202 }
  0x6e   :  { %v198_v2 = vpop.permute.xlu2 %197 }
  0x79   :  { %v69_v27 = vpop.permute.xlu0 %68 }
  0x7a   :  { %v59_v29 = vpop.permute.xlu1 %58 }
  0x81   :  { %v64_v31 = vpop.permute.xlu0 %63 }
  0x82   :  { %v54_v35 = vpop.permute.xlu1 %53 }
  0x89   :  { %v193_v3 = vpop.permute.xlu0 %192 }
  0x8a   :  { %v188_v6 = vpop.permute.xlu1 %187 }
  0xbe   :  { %v149_v34 = vpop.f32.mrf.mxu0 }
  0xbf   :  { %v150_v37 = vadd.f32 %v149_v34, %v54_v35 }
  0xc1   :  { %v161_v41 = vmul.f32 0.5, %v150_v37 }
  0xc4   :  { %v152_v28 = vpop.f32.mrf.mxu3 }
  0xc5   :  { %v153_v33 = vadd.f32 %v152_v28, %v59_v29 }
  0xc7   :  { %v162_v38 = vmul.f32 0.5, %v153_v33 }
  0xcc   :  { %v155_v30 = vpop.f32.mrf.mxu3 }
  0xcd   :  { %v156_v32 = vadd.f32 %v155_v30, %v64_v31 }
  0xcf   :  { %v163_v36 = vmul.f32 0.5, %v156_v32 }
  0xd1   :  { %360 = vtanh.f32 %v163_v36 }
  0xd2   :  { %362 = vtanh.f32 %v162_v38 }
  0xd4   :  { %v158_v39 = vpop.f32.mrf.mxu3 }
  0xd5   :  { %v159_v40 = vadd.f32 %v158_v39, %v69_v27  ;;  %v268_v27 = vpop.permute.xlu2 %267 }
  0xd7   :  { %v164_v42 = vmul.f32 0.5, %v159_v40  ;;  %v361_v43 = vpop.eup %360 }
  0xd8   :  { %v363_v44 = vpop.eup %362  ;;  %v171_v47 = vadd.f32 1.0, %v361_v43 }
  0xd9   :  { %364 = vtanh.f32 %v164_v42  ;;  %v170_v50 = vadd.f32 1.0, %v363_v44 }
  0xda   :  { %366 = vtanh.f32 %v161_v41  ;;  %v175_v52 = vmul.f32 0.5, %v171_v47 }
  0xdb   :  { %v174_v54 = vmul.f32 0.5, %v170_v50 }
  0xdf   :  { %v365_v45 = vpop.eup %364 }
  0xe0   :  { %v172_v46 = vadd.f32 1.0, %v365_v45  ;;  %v367_v48 = vpop.eup %366 }
  0xe1   :  { %v169_v53 = vadd.f32 1.0, %v367_v48 }
  0xe2   :  { %v176_v49 = vmul.f32 0.5, %v172_v46 }
  0xe3   :  { %v173_v55 = vmul.f32 0.5, %v169_v53 }
  0xe4   :  { %230 = vmatpush.msra.mxu1 %v176_v49 }
  0xe6   :  { %231 = vmatpush.msra.mxu1 %v175_v52 }
  0xe8   :  { %232 = vmatpush.msra.mxu1 %v174_v54 }
  0xea   :  { %233 = vmatpush.msra.mxu1 %v173_v55 }
  0xeb   :  { %334 = vmatmul.msk.f32.vlgmr.msra.gmra.mxu1 %vm205_vm1, %v177_v56 }
  0xf3   :  { %335 = vmatmul.msk.f32.gmra.mxu1 %vm205_vm1, %v178_v58 }
  0xfb   :  { %336 = vmatmul.msk.f32.gmra.mxu1 %vm205_vm1, %v179_v60 }
 0x103   :  { %337 = vmatmul.msk.f32.gmra.mxu1 %vm205_vm1, %v180_v61 }
 0x168   :  { %v235_v62 = vpop.f32.mrf.mxu1 }
 0x169   :  { %v236_v7 = vadd.f32 %v235_v62, %v188_v6 }
 0x16b   :  { %v247_v12 = vmul.f32 0.5, %v236_v7 }
 0x170   :  { %v238_v0 = vpop.f32.mrf.mxu1 }
 0x171   :  { %v239_v5 = vadd.f32 %v238_v0, %v193_v3 }
 0x173   :  { %v248_v9 = vmul.f32 0.5, %v239_v5 }
 0x178   :  { %v241_v1 = vpop.f32.mrf.mxu1 }
 0x179   :  { %v242_v4 = vadd.f32 %v241_v1, %v198_v2 }
 0x17b   :  { %v249_v8 = vmul.f32 0.5, %v242_v4 }
 0x17d   :  { %368 = vtanh.f32 %v249_v8 }
 0x17e   :  { %370 = vtanh.f32 %v248_v9 }
 0x180   :  { %v244_v10 = vpop.f32.mrf.mxu1 }
 0x181   :  { %v245_v11 = vadd.f32 %v244_v10, %v203_v63 }
 0x183   :  { %v250_v13 = vmul.f32 0.5, %v245_v11  ;;  %v369_v14 = vpop.eup %368 }
 0x184   :  { %v371_v15 = vpop.eup %370  ;;  %v257_v18 = vadd.f32 1.0, %v369_v14 }
 0x185   :  { %372 = vtanh.f32 %v250_v13  ;;  %v256_v21 = vadd.f32 1.0, %v371_v15 }
 0x186   :  { %374 = vtanh.f32 %v247_v12  ;;  %v261_v22 = vmul.f32 0.5, %v257_v18 }
 0x187   :  { %v260_v24 = vmul.f32 0.5, %v256_v21 }
 0x18b   :  { %v373_v16 = vpop.eup %372 }
 0x18c   :  { %v258_v17 = vadd.f32 1.0, %v373_v16  ;;  %v375_v19 = vpop.eup %374 }
 0x18d   :  { %v255_v23 = vadd.f32 1.0, %v375_v19 }
 0x18e   :  { %v262_v20 = vmul.f32 0.5, %v258_v17 }
 0x18f   :  { %v259_v25 = vmul.f32 0.5, %v255_v23 }
 0x190   :  { %285 = vmatpush.msra.mxu2 %v262_v20 }
 0x192   :  { %286 = vmatpush.msra.mxu2 %v261_v22 }
 0x194   :  { %287 = vmatpush.msra.mxu2 %v260_v24 }
 0x196   :  { %288 = vmatpush.msra.mxu2 %v259_v25 }
 0x197   :  { %338 = vmatmul.msk.f32.vlgmr.msra.gmra.mxu2 %vm205_vm1, %v263_v26 }
 0x21a   :  { %v290_v28 = vpop.f32.mrf.mxu2 }
 0x21b   :  { %v291_v29 = vadd.f32 %v290_v28, %v268_v27 }
 0x21d   :  { %v293_v30 = vmul.f32 0.5, %v291_v29 }
 0x21f   :  { %376 = vtanh.f32 %v293_v30 }
 0x225   :  { %v377_v31 = vpop.eup %376 }
 0x226   :  { %v295_v32 = vadd.f32 1.0, %v377_v31 }
 0x228   :  { %v296_v33 = vmul.f32 0.5, %v295_v32 }
 0x22a   :  { %297 = vst [vmem:[#allocation2] sm:$0x3] %v296_v33 }
 0x22b   :  { %308 = dma.vmem_to_hbm [thread:$0]  %s304_s17, 32, %s306_s20, [#allocation3]  }
 0x22c   :  { %402 = dma.done.wait [#allocation3], 32  }
 0x22d   :  { %403 = vsyncadd [#allocation3], 4294967264 }
 0x22e   :  { %313 = vsyncpa [#allocation3], 1 }

</bundles_post_ra>
